<compile_context>
chip_gen: v5e
topology: v5e:2x2
jax: 0.10.0
libtpu: 0.0.40
codegen_flags: <defaults>
</compile_context>

<pallas_src>
import math
import jax
import jax.numpy as jnp
from jax.experimental import pallas as pl
from jax.experimental.pallas import tpu as pltpu


HIDDEN = 256
OUT_PAD = 128  # lane-dense output width; only column 0 is the real V(s)


def _value_kernel(x_ref, w1_ref, b1_ref, w2_ref, b2_ref, w3_ref, b3_ref, o_ref):
    # Fused 3-layer MLP on one (TB, state_dim) batch tile.
    # Matmul inputs are bf16 (full-rate MXU on v5e/v6e/v7x); accumulation and
    # all elementwise ops (bias add, ReLU) stay f32 for value-head numerics.
    x = x_ref[...].astype(jnp.bfloat16)                                   # in-kernel cast
    h1 = jnp.dot(x, w1_ref[...], preferred_element_type=jnp.float32) + b1_ref[...]
    h1 = jnp.maximum(h1, 0.0).astype(jnp.bfloat16)
    h2 = jnp.dot(h1, w2_ref[...], preferred_element_type=jnp.float32) + b2_ref[...]
    h2 = jnp.maximum(h2, 0.0).astype(jnp.bfloat16)
    # Lane-dense (TB, 128) store: padding columns of w3/b3 are zero, so only
    # column 0 carries the value estimate.
    o_ref[...] = jnp.dot(h2, w3_ref[...], preferred_element_type=jnp.float32) + b3_ref[...]


def _round_up(x, m):
    return ((x + m - 1) // m) * m


def prepare_value_params(params):
    """One-time packing of the raw (f32) params for the kernel.

    Pads l3 from width 1 to a lane-dense 128-wide head (zero columns) and
    casts the matmul weights to bf16.  Call once (and again after every
    optimizer step) -- NOT inside the forward path.
    """
    w1, b1, w2, b2, w3, b3 = params
    w3p = jnp.zeros((HIDDEN, OUT_PAD), jnp.float32).at[:, :1].set(w3)
    b3p = jnp.zeros((1, OUT_PAD), jnp.float32).at[:, :1].set(b3)
    return (w1.astype(jnp.bfloat16), b1,
            w2.astype(jnp.bfloat16), b2,
            w3p.astype(jnp.bfloat16), b3p)


def _choose_tile(B, tb):
    """Pick the batch tile TB and padded batch size.

    <=256 rows: single tile (grid overhead >> compute, nothing to split).
    >256 rows : tiles are a multiple of 256, capped at tb, and there are at
                least 2 tiles so v7x's two TensorCores both get a slice of
                the "parallel" batch axis (free on v5e/v6e).
    """
    B8 = _round_up(B, 8)
    if B8 <= 256:
        TB = B8
    else:
        max_tb = max(256, _round_up(tb, 256))
        B256 = _round_up(B, 256)
        TB = max(256, min(max_tb, _round_up(B256 // 2, 256)))
    return TB, _round_up(B, TB)


def value_forward(state, prepared_params, *, tb=1024):
    """state: [B, state_dim] float32, prepared_params from prepare_value_params
    -> [B, 1] float32."""
    w1, b1, w2, b2, w3p, b3p = prepared_params
    B, D = state.shape

    TB, B_pad = _choose_tile(B, tb)
    if B_pad != B:
        # Zero tail rows; they are sliced away below so no garbage leaks out.
        state = jnp.pad(state, ((0, B_pad - B), (0, 0)))

    grid = (B_pad // TB,)

    def resident(a):
        # Whole array resident in VMEM across all batch tiles (constant index map).
        return pl.BlockSpec(a.shape, lambda i: (0,) * a.ndim)

    flops = 2 * B_pad * (D * HIDDEN + HIDDEN * HIDDEN + HIDDEN * OUT_PAD)
    bytes_accessed = (
        state.size * 4
        + (w1.size + w2.size + w3p.size) * 2
        + (b1.size + b2.size + b3p.size) * 4
        + B_pad * OUT_PAD * 4
    )

    out = pl.pallas_call(
        _value_kernel,
        out_shape=jax.ShapeDtypeStruct((B_pad, OUT_PAD), jnp.float32),
        grid=grid,
        in_specs=[
            pl.BlockSpec((TB, D), lambda i: (i, 0)),   # streamed f32 state tile
            resident(w1), resident(b1),
            resident(w2), resident(b2),
            resident(w3p), resident(b3p),
        ],
        out_specs=pl.BlockSpec((TB, OUT_PAD), lambda i: (i, 0)),
        compiler_params=pltpu.CompilerParams(
            dimension_semantics=("parallel",),          # v7x: batch tiles over 2 TCs
        ),
        cost_estimate=pl.CostEstimate(
            flops=flops, transcendentals=0, bytes_accessed=bytes_accessed),
    )(state, w1, b1, w2, b2, w3p, b3p)

    return out[:B, :1]


def init_value_params(key, state_dim, hidden=HIDDEN, init_w=0.003):
    """Deterministic init mirroring PyTorch defaults:
       l1,l2: U(-1/sqrt(fan_in), 1/sqrt(fan_in));  l3: U(-init_w, init_w)."""
    k1, k2, k3, k4, k5, k6 = jax.random.split(key, 6)
    lim1 = 1.0 / math.sqrt(state_dim)
    lim2 = 1.0 / math.sqrt(hidden)
    w1 = jax.random.uniform(k1, (state_dim, hidden), jnp.float32, -lim1, lim1)
    b1 = jax.random.uniform(k2, (1, hidden), jnp.float32, -lim1, lim1)
    w2 = jax.random.uniform(k3, (hidden, hidden), jnp.float32, -lim2, lim2)
    b2 = jax.random.uniform(k4, (1, hidden), jnp.float32, -lim2, lim2)
    w3 = jax.random.uniform(k5, (hidden, 1), jnp.float32, -init_w, init_w)
    b3 = jax.random.uniform(k6, (1, 1), jnp.float32, -init_w, init_w)
    return (w1, b1, w2, b2, w3, b3)


def value_reference_f32(state, params):
    w1, b1, w2, b2, w3, b3 = params
    h1 = jnp.maximum(state @ w1 + b1, 0.0)
    h2 = jnp.maximum(h1 @ w2 + b2, 0.0)
    return h2 @ w3 + b3


def value_reference_bf16(state, params):
    # Same precision recipe as the kernel (bf16 matmul inputs, f32 accumulate).
    w1, b1, w2, b2, w3, b3 = params
    x = state.astype(jnp.bfloat16)
    h1 = jnp.dot(x, w1.astype(jnp.bfloat16), preferred_element_type=jnp.float32) + b1
    h1 = jnp.maximum(h1, 0.0).astype(jnp.bfloat16)
    h2 = jnp.dot(h1, w2.astype(jnp.bfloat16), preferred_element_type=jnp.float32) + b2
    h2 = jnp.maximum(h2, 0.0).astype(jnp.bfloat16)
    return jnp.dot(h2, w3.astype(jnp.bfloat16), preferred_element_type=jnp.float32) + b3


if __name__ == "__main__":
    key = jax.random.PRNGKey(0)
    kp, kx1, kx2, kx3 = jax.random.split(key, 4)

    batch, state_dim = 8, 8  # small env-like observation dim
    params = init_value_params(kp, state_dim)
    prepared = prepare_value_params(params)   # hoisted: once, not per forward

    fwd = jax.jit(value_forward)

    # Test 1: tiny batch (single tile, TB = 8).
    state = jax.random.normal(kx1, (batch, state_dim), dtype=jnp.float32)
    out = jax.block_until_ready(fwd(state, prepared))
    assert out.shape == (batch, 1)
    ref_bf = value_reference_bf16(state, params)
    ref_f32 = value_reference_f32(state, params)
    assert jnp.allclose(out, ref_bf, atol=1e-4, rtol=1e-3)
    assert jnp.allclose(out, ref_f32, atol=5e-3, rtol=5e-2)

    # Test 2: batch not a multiple of 8 (exercises padding + tail slicing).
    batch2 = 20
    state2 = jax.random.normal(kx2, (batch2, state_dim), dtype=jnp.float32)
    out2 = jax.block_until_ready(fwd(state2, prepared))
    assert out2.shape == (batch2, 1)
    ref2 = value_reference_bf16(state2, params)
    assert jnp.allclose(out2, ref2, atol=1e-4, rtol=1e-3)

    # Test 3: SAC-sized batch (exercises the multi-tile / 2-TensorCore path:
    # TB = 256, grid = (2,)).
    batch3 = 512
    state3 = jax.random.normal(kx3, (batch3, state_dim), dtype=jnp.float32)
    out3 = jax.block_until_ready(fwd(state3, prepared))
    assert out3.shape == (batch3, 1)
    ref3 = value_reference_bf16(state3, params)
    assert jnp.allclose(out3, ref3, atol=1e-4, rtol=1e-3)

    print("KERNEL_OK")
</pallas_src>

<mosaic_0001>
module attributes {stable_mosaic.version = 11 : i64} {
  func.func @_value_kernel(%arg0: i32, %arg1: memref<8x8xf32, #tpu.memory_space<vmem>>, %arg2: memref<8x256xbf16, #tpu.memory_space<vmem>>, %arg3: memref<1x256xf32, #tpu.memory_space<vmem>>, %arg4: memref<256x256xbf16, #tpu.memory_space<vmem>>, %arg5: memref<1x256xf32, #tpu.memory_space<vmem>>, %arg6: memref<256x128xbf16, #tpu.memory_space<vmem>>, %arg7: memref<1x128xf32, #tpu.memory_space<vmem>>, %arg8: memref<8x128xf32, #tpu.memory_space<vmem>>) attributes {dimension_semantics = [#tpu.dimension_semantics<parallel>], iteration_bounds = array<i64: 1>, scalar_prefetch = 0 : i64, scratch_operands = 0 : i64, tpu.core_type = #tpu.core_type<tc>, window_params = [{transform_indices = @transform_0, window_bounds = array<i64: 8, 8>}, {pipeline_mode = #tpu.pipeline_mode<synchronous>, transform_indices = @transform_1, window_bounds = array<i64: 8, 256>}, {pipeline_mode = #tpu.pipeline_mode<synchronous>, transform_indices = @transform_2, window_bounds = array<i64: 1, 256>}, {pipeline_mode = #tpu.pipeline_mode<synchronous>, transform_indices = @transform_3, window_bounds = array<i64: 256, 256>}, {pipeline_mode = #tpu.pipeline_mode<synchronous>, transform_indices = @transform_4, window_bounds = array<i64: 1, 256>}, {pipeline_mode = #tpu.pipeline_mode<synchronous>, transform_indices = @transform_5, window_bounds = array<i64: 256, 128>}, {pipeline_mode = #tpu.pipeline_mode<synchronous>, transform_indices = @transform_6, window_bounds = array<i64: 1, 128>}, {transform_indices = @transform_7, window_bounds = array<i64: 8, 128>}]} {
    %c0 = arith.constant 0 : index
    %c0_0 = arith.constant 0 : index
    %0 = vector.load %arg1[%c0, %c0_0] : memref<8x8xf32, #tpu.memory_space<vmem>>, vector<8x8xf32>
    %1 = arith.truncf %0 : vector<8x8xf32> to vector<8x8xbf16>
    %c0_1 = arith.constant 0 : index
    %c0_2 = arith.constant 0 : index
    %2 = vector.load %arg2[%c0_1, %c0_2] : memref<8x256xbf16, #tpu.memory_space<vmem>>, vector<8x256xbf16>
    %cst = arith.constant dense<0.000000e+00> : vector<8x256xf32>
    %3 = tpu.matmul %1, %2, %cst {dimension_numbers = #tpu.dot_dimension_numbers<[1], [0], [0], [1], [0, 0, 1, 1], [], []>} : vector<8x8xbf16>, vector<8x256xbf16>, vector<8x256xf32> -> vector<8x256xf32>
    %c0_3 = arith.constant 0 : index
    %c0_4 = arith.constant 0 : index
    %4 = vector.load %arg3[%c0_3, %c0_4] : memref<1x256xf32, #tpu.memory_space<vmem>>, vector<1x256xf32>
    %5 = vector.broadcast %4 : vector<1x256xf32> to vector<8x256xf32>
    %6 = arith.addf %3, %5 : vector<8x256xf32>
    %cst_5 = arith.constant 0.000000e+00 : f32
    %7 = vector.broadcast %cst_5 : f32 to vector<8x256xf32>
    %8 = arith.maximumf %6, %7 : vector<8x256xf32>
    %9 = arith.truncf %8 : vector<8x256xf32> to vector<8x256xbf16>
    %c0_6 = arith.constant 0 : index
    %c0_7 = arith.constant 0 : index
    %10 = vector.load %arg4[%c0_6, %c0_7] : memref<256x256xbf16, #tpu.memory_space<vmem>>, vector<256x256xbf16>
    %cst_8 = arith.constant dense<0.000000e+00> : vector<8x256xf32>
    %11 = tpu.matmul %9, %10, %cst_8 {dimension_numbers = #tpu.dot_dimension_numbers<[1], [0], [0], [1], [0, 0, 1, 1], [], []>} : vector<8x256xbf16>, vector<256x256xbf16>, vector<8x256xf32> -> vector<8x256xf32>
    %c0_9 = arith.constant 0 : index
    %c0_10 = arith.constant 0 : index
    %12 = vector.load %arg5[%c0_9, %c0_10] : memref<1x256xf32, #tpu.memory_space<vmem>>, vector<1x256xf32>
    %13 = vector.broadcast %12 : vector<1x256xf32> to vector<8x256xf32>
    %14 = arith.addf %11, %13 : vector<8x256xf32>
    %cst_11 = arith.constant 0.000000e+00 : f32
    %15 = vector.broadcast %cst_11 : f32 to vector<8x256xf32>
    %16 = arith.maximumf %14, %15 : vector<8x256xf32>
    %17 = arith.truncf %16 : vector<8x256xf32> to vector<8x256xbf16>
    %c0_12 = arith.constant 0 : index
    %c0_13 = arith.constant 0 : index
    %18 = vector.load %arg6[%c0_12, %c0_13] : memref<256x128xbf16, #tpu.memory_space<vmem>>, vector<256x128xbf16>
    %cst_14 = arith.constant dense<0.000000e+00> : vector<8x128xf32>
    %19 = tpu.matmul %17, %18, %cst_14 {dimension_numbers = #tpu.dot_dimension_numbers<[1], [0], [0], [1], [0, 0, 1, 1], [], []>} : vector<8x256xbf16>, vector<256x128xbf16>, vector<8x128xf32> -> vector<8x128xf32>
    %c0_15 = arith.constant 0 : index
    %c0_16 = arith.constant 0 : index
    %20 = vector.load %arg7[%c0_15, %c0_16] : memref<1x128xf32, #tpu.memory_space<vmem>>, vector<1x128xf32>
    %21 = vector.broadcast %20 : vector<1x128xf32> to vector<8x128xf32>
    %22 = arith.addf %19, %21 : vector<8x128xf32>
    %c0_17 = arith.constant 0 : index
    %c0_18 = arith.constant 0 : index
    %23 = vector.load %arg8[%c0_17, %c0_18] : memref<8x128xf32, #tpu.memory_space<vmem>>, vector<8x128xf32>
    tpu.vector_store %arg8[%c0_17, %c0_18], %22 {strides = array<i32>} : memref<8x128xf32, #tpu.memory_space<vmem>>, vector<8x128xf32>,
    return
  }
  func.func @transform_0(%arg0: i32) -> (i32, i32) {
    %c0_i32 = arith.constant 0 : i32
    %c0_i32_0 = arith.constant 0 : i32
    return %arg0, %c0_i32 : i32, i32
  }
  func.func @transform_1(%arg0: i32) -> (i32, i32) {
    %c0_i32 = arith.constant 0 : i32
    %c0_i32_0 = arith.constant 0 : i32
    %c0_i32_1 = arith.constant 0 : i32
    return %c0_i32, %c0_i32_0 : i32, i32
  }
  func.func @transform_2(%arg0: i32) -> (i32, i32) {
    %c0_i32 = arith.constant 0 : i32
    %c0_i32_0 = arith.constant 0 : i32
    %c0_i32_1 = arith.constant 0 : i32
    return %c0_i32, %c0_i32_0 : i32, i32
  }
  func.func @transform_3(%arg0: i32) -> (i32, i32) {
    %c0_i32 = arith.constant 0 : i32
    %c0_i32_0 = arith.constant 0 : i32
    %c0_i32_1 = arith.constant 0 : i32
    return %c0_i32, %c0_i32_0 : i32, i32
  }
  func.func @transform_4(%arg0: i32) -> (i32, i32) {
    %c0_i32 = arith.constant 0 : i32
    %c0_i32_0 = arith.constant 0 : i32
    %c0_i32_1 = arith.constant 0 : i32
    return %c0_i32, %c0_i32_0 : i32, i32
  }
  func.func @transform_5(%arg0: i32) -> (i32, i32) {
    %c0_i32 = arith.constant 0 : i32
    %c0_i32_0 = arith.constant 0 : i32
    %c0_i32_1 = arith.constant 0 : i32
    return %c0_i32, %c0_i32_0 : i32, i32
  }
  func.func @transform_6(%arg0: i32) -> (i32, i32) {
    %c0_i32 = arith.constant 0 : i32
    %c0_i32_0 = arith.constant 0 : i32
    %c0_i32_1 = arith.constant 0 : i32
    return %c0_i32, %c0_i32_0 : i32, i32
  }
  func.func @transform_7(%arg0: i32) -> (i32, i32) {
    %c0_i32 = arith.constant 0 : i32
    %c0_i32_0 = arith.constant 0 : i32
    return %arg0, %c0_i32 : i32, i32
  }
}

</mosaic_0001>

<bundles_post_ra>
// kernel: value_forward.1
= control target key start
LH: loop header
LB: loop body
LE: loop exit
PB: predicated region body
PF: predicated region fallthrough
CT: control target
= control target key end

     0   :  { %12 = vsyncpa [#allocation3], 0  ;;  %s1029_s0 = inlined_call_operand.hbm [shape: f32[8,8], index: 0, kind: input, shape index: {}]   ;;  %s1030_s1 = inlined_call_operand.hbm [shape: bf16[8,256], index: 1, kind: input, shape index: {}]   ;;  %s1031_s2 = inlined_call_operand.hbm [shape: f32[1,256], index: 2, kind: input, shape index: {}]   ;;  %s1032_s3 = inlined_call_operand.hbm [shape: bf16[256,256], index: 3, kind: input, shape index: {}]   ;;  %s1033_s4 = inlined_call_operand.vmem [shape: f32[1,256], index: 4, kind: input, shape index: {}]   ;;  %s1034_s5 = inlined_call_operand.hbm [shape: bf16[256,128], index: 5, kind: input, shape index: {}]   ;;  %s1035_s6 = inlined_call_operand.vmem [shape: f32[1,128], index: 6, kind: input, shape index: {}]   ;;  %s1036_s7 = inlined_call_operand.vmem [shape: f32[8,128], index: 7, kind: output, shape index: {}]  }
   0x1   :  { %13 = vsyncpa [#allocation5], 0  ;;  %s31_s26 = sshll.u32 %s1030_s1, 4  ;;  %s32_s26 = int_to_ptr.hbm [resolvable:$true] %s31_s26 }
   0x2   :  { %14 = vsyncpa [#allocation8], 0  ;;  %s952_s27 = smov [#allocation4]   ;;  %s52_s8 = sshll.u32 %s1032_s3, 4  ;;  %s53_s8 = int_to_ptr.hbm [resolvable:$true] %s52_s8 }
   0x3   :  { %s33_s28 = sshll.u32 %s952_s27, 4  ;;  %s953_s9 = smov [#allocation7]   ;;  %s34_s28 = int_to_ptr.vmem [resolvable:$true] %s33_s28 }
   0x4   :  { %36 = dma.hbm_to_vmem [thread:$0]  %s32_s26, 128, %s34_s28, [#allocation5]  }
   0x5   :  { %s54_s10 = sshll.u32 %s953_s9, 4  ;;  %s954_s11 = smov 128   ;;  %s55_s10 = int_to_ptr.vmem [resolvable:$true] %s54_s10 }
   0x6   :  { %s955_s12 = smov 8   ;;  %s20_s1 = sshll.u32 %s1029_s0, 4  ;;  %s21_s1 = int_to_ptr.hbm [resolvable:$true] %s20_s1 }
   0x7   :  { %60 = dma.hbm_to_vmem [thread:$0]  %s53_s8, 4096, %s55_s10, [#allocation8], %s954_s11, %s954_s11, %s955_s12  }
   0x8   :  { %s956_s15 = smov [#allocation2]   ;;  %s42_s3 = sshll.u32 %s1031_s2, 4  ;;  %s43_s3 = int_to_ptr.hbm [resolvable:$true] %s42_s3 }
   0x9   :  { %s22_s16 = sshll.u32 %s956_s15, 4  ;;  %s957_s19 = smov [#allocation6]   ;;  %s23_s16 = int_to_ptr.vmem [resolvable:$true] %s22_s16 }
   0xa   :  { %25 = dma.hbm_to_vmem [thread:$0]  %s21_s1, 128, %s23_s16, [#allocation3]  }
   0xb   :  { %s44_s20 = sshll.u32 %s957_s19, 4  ;;  %s67_s23 = sshll.u32 %s1034_s5, 4  ;;  %s45_s20 = int_to_ptr.vmem [resolvable:$true] %s44_s20  ;;  %s68_s23 = int_to_ptr.hbm [resolvable:$true] %s67_s23 }
   0xc   :  { %47 = dma.hbm_to_vmem [thread:$0]  %s43_s3, 32, %s45_s20, [#allocation5]  }
   0xd   :  { %s958_s0 = smov [#allocation9]   ;;  %s959_s25 = smov 64  }
   0xe   :  { %s69_s24 = sshll.u32 %s958_s0, 4  ;;  %s960_s26 = smov 4   ;;  %s70_s24 = int_to_ptr.vmem [resolvable:$true] %s69_s24 }
   0xf   :  { %75 = dma.hbm_to_vmem [thread:$0]  %s68_s23, 2048, %s70_s24, [#allocation8], %s959_s25, %s959_s25, %s960_s26  }
  0x10   :  { %946 = dma.done.wait [#allocation3], 128  }
  0x11   :  { %947 = vsyncadd [#allocation3], 4294967168 }
  0x12   :  { %948 = dma.done.wait [#allocation5], 160  }
  0x13   :  { %949 = vsyncadd [#allocation5], 4294967136 }
  0x14   :  { %950 = dma.done.wait [#allocation8], 6144  }
  0x15   :  { %951 = vsyncadd [#allocation8], 4294961152  ;;  %v101_v0 = vld [vmem:[#allocation4] sm:$0xff]  ;;  %vm117_vm0 = vcmask 1043456   ;;  %v99_v1 = vld [vmem:[#allocation2] sm:$0xff]  ;;  %vm113_vm1 = vcmask 64512  }
  0x16   :  { %v634_v2 = vld [vmem:[#allocation7 + $0x70] sm:$0xf]  ;;  %v109_v3 = vunpack.c.l.b16 %v101_v0  ;;  %v110_v4 = vunpack.c.h.b16 %v101_v0  ;;  %v783_v5 = vld [vmem:[#allocation7 + $0x74] sm:$0xf0]  ;;  %v782_v10 = vld [vmem:[#allocation7 + $0x74] sm:$0xf]  ;;  %v100_v26 = vpack.c.bf16 %v99_v1, %v99_v1 }
  0x17   :  { %v698_v6 = vld [vmem:[#allocation7 + $0xf0] sm:$0xf]  ;;  %v799_v7 = vld [vmem:[#allocation7 + $0xf4] sm:$0xf0]  ;;  %v635_v8 = vor.u32 %v783_v5, %v634_v2  ;;  %v636_v11 = vld [vmem:[#allocation7 + $0x78] sm:$0xf0] }
  0x18   :  { %v699_v9 = vor.u32 %v799_v7, %v698_v6  ;;  %v798_v12 = vld [vmem:[#allocation7 + $0xf4] sm:$0xf]  ;;  %v111_v13 = vpack.c.b16 %v109_v3, %v109_v3  ;;  %v112_v14 = vpack.c.b16 %v110_v4, %v110_v4  ;;  %v639_v15 = vor.u32 %v782_v10, %v636_v11  ;;  %v700_v16 = vld [vmem:[#allocation7 + $0xf8] sm:$0xf0]  ;;  %v626_v17 = vld [vmem:[#allocation7 + $0x60] sm:$0xf] }
  0x19   :  { %v781_v18 = vld [vmem:[#allocation7 + $0x64] sm:$0xf0]  ;;  %352 = vmatpush.bf16.msra.mxu2 %v635_v8  ;;  %v703_v19 = vor.u32 %v798_v12, %v700_v16  ;;  %v690_v21 = vld [vmem:[#allocation7 + $0xe0] sm:$0xf]  ;;  %v780_v23 = vld [vmem:[#allocation7 + $0x64] sm:$0xf] }
  0x1a   :  { %365 = vmatpush.bf16.msra.mxu3 %v699_v9  ;;  %v627_v20 = vor.u32 %v781_v18, %v626_v17  ;;  %v797_v22 = vld [vmem:[#allocation7 + $0xe4] sm:$0xf0]  ;;  %v119_v24 = vsel %vm117_vm0, %v111_v13, 0  ;;  %v122_v25 = vsel %vm117_vm0, %v112_v14, 0  ;;  %v628_v28 = vld [vmem:[#allocation7 + $0x68] sm:$0xf0] }
  0x1b   :  { %v691_v27 = vor.u32 %v797_v22, %v690_v21  ;;  %v796_v29 = vld [vmem:[#allocation7 + $0xe4] sm:$0xf]  ;;  %131 = vmatpush.bf16.msra.mxu0 %v119_v24  ;;  %144 = vmatpush.bf16.msra.mxu1 %v122_v25  ;;  %v692_v30 = vld [vmem:[#allocation7 + $0xe8] sm:$0xf0]  ;;  %v618_v31 = vld [vmem:[#allocation7 + $0x50] sm:$0xf]  ;;  %v631_v33 = vor.u32 %v780_v23, %v628_v28 }
  0x1c   :  { %v779_v32 = vld [vmem:[#allocation7 + $0x54] sm:$0xf0]  ;;  %v695_v34 = vor.u32 %v796_v29, %v692_v30  ;;  %v682_v35 = vld [vmem:[#allocation7 + $0xd0] sm:$0xf]  ;;  %v778_v37 = vld [vmem:[#allocation7 + $0x54] sm:$0xf] }
  0x1d   :  { %v795_v36 = vld [vmem:[#allocation7 + $0xd4] sm:$0xf0]  ;;  %353 = vmatpush.bf16.msra.mxu2 %v627_v20  ;;  %v619_v38 = vor.u32 %v779_v32, %v618_v31  ;;  %v620_v40 = vld [vmem:[#allocation7 + $0x58] sm:$0xf0]  ;;  %v794_v41 = vld [vmem:[#allocation7 + $0xd4] sm:$0xf] }
  0x1e   :  { %366 = vmatpush.bf16.msra.mxu3 %v691_v27  ;;  %v683_v39 = vor.u32 %v795_v36, %v682_v35  ;;  %v684_v42 = vld [vmem:[#allocation7 + $0xd8] sm:$0xf0]  ;;  %574 = vmatmul.msk.bf16.vlgmr.msra.gmra.mxu0 %vm113_vm1, %v100_v26  ;;  %v610_v43 = vld [vmem:[#allocation7 + $0x40] sm:$0xf]  ;;  %v777_v44 = vld [vmem:[#allocation7 + $0x44] sm:$0xf0]  ;;  %v623_v47 = vor.u32 %v778_v37, %v620_v40 }
  0x1f   :  { %378 = vmatpush.bf16.msrb.mxu0 %v639_v15  ;;  %391 = vmatpush.bf16.msrb.mxu1 %v703_v19  ;;  %v674_v45 = vld [vmem:[#allocation7 + $0xc0] sm:$0xf]  ;;  %v793_v46 = vld [vmem:[#allocation7 + $0xc4] sm:$0xf0]  ;;  %v687_v48 = vor.u32 %v794_v41, %v684_v42  ;;  %v776_v49 = vld [vmem:[#allocation7 + $0x44] sm:$0xf]  ;;  %v611_v51 = vor.u32 %v777_v44, %v610_v43 }
  0x20   :  { %575 = vmatmul.msk.bf16.vlgmr.msra.gmra.mxu1 %vm113_vm1, %v100_v26  ;;  %v612_v50 = vld [vmem:[#allocation7 + $0x48] sm:$0xf0]  ;;  %v675_v52 = vor.u32 %v793_v46, %v674_v45  ;;  %v792_v53 = vld [vmem:[#allocation7 + $0xc4] sm:$0xf]  ;;  %v602_v55 = vld [vmem:[#allocation7 + $0x30] sm:$0xf] }
  0x21   :  { %354 = vmatpush.bf16.msra.mxu2 %v619_v38  ;;  %v676_v54 = vld [vmem:[#allocation7 + $0xc8] sm:$0xf0]  ;;  %v775_v56 = vld [vmem:[#allocation7 + $0x34] sm:$0xf0]  ;;  %v666_v57 = vld [vmem:[#allocation7 + $0xb0] sm:$0xf]  ;;  %v615_v59 = vor.u32 %v776_v49, %v612_v50 }
  0x22   :  { %367 = vmatpush.bf16.msra.mxu3 %v683_v39  ;;  %v791_v58 = vld [vmem:[#allocation7 + $0xb4] sm:$0xf0]  ;;  %v679_v60 = vor.u32 %v792_v53, %v676_v54  ;;  %v774_v61 = vld [vmem:[#allocation7 + $0x34] sm:$0xf]  ;;  %v604_v62 = vld [vmem:[#allocation7 + $0x38] sm:$0xf0]  ;;  %v603_v0 = vor.u32 %v775_v56, %v602_v55 }
  0x23   :  { %379 = vmatpush.bf16.msrb.mxu0 %v631_v33  ;;  %392 = vmatpush.bf16.msrb.mxu1 %v695_v34  ;;  %v790_v63 = vld [vmem:[#allocation7 + $0xb4] sm:$0xf]  ;;  %v667_v1 = vor.u32 %v791_v58, %v666_v57  ;;  %v668_v2 = vld [vmem:[#allocation7 + $0xb8] sm:$0xf0]  ;;  %v594_v3 = vld [vmem:[#allocation7 + $0x20] sm:$0xf]  ;;  %v607_v7 = vor.u32 %v774_v61, %v604_v62 }
  0x24   :  { %v773_v4 = vld [vmem:[#allocation7 + $0x24] sm:$0xf0]  ;;  %v658_v5 = vld [vmem:[#allocation7 + $0xa0] sm:$0xf]  ;;  %v671_v8 = vor.u32 %v790_v63, %v668_v2  ;;  %v772_v9 = vld [vmem:[#allocation7 + $0x24] sm:$0xf] }
  0x25   :  { %355 = vmatpush.bf16.msra.mxu2 %v611_v51  ;;  %v789_v6 = vld [vmem:[#allocation7 + $0xa4] sm:$0xf0]  ;;  %v595_v10 = vor.u32 %v773_v4, %v594_v3  ;;  %v596_v12 = vld [vmem:[#allocation7 + $0x28] sm:$0xf0]  ;;  %v788_v13 = vld [vmem:[#allocation7 + $0xa4] sm:$0xf] }
  0x26   :  { %368 = vmatpush.bf16.msra.mxu3 %v675_v52  ;;  %v659_v11 = vor.u32 %v789_v6, %v658_v5  ;;  %v660_v14 = vld [vmem:[#allocation7 + $0xa8] sm:$0xf0]  ;;  %v599_v15 = vor.u32 %v772_v9, %v596_v12  ;;  %v586_v17 = vld [vmem:[#allocation7 + $0x10] sm:$0xf]  ;;  %v771_v18 = vld [vmem:[#allocation7 + $0x14] sm:$0xf0] }
  0x27   :  { %380 = vmatpush.bf16.msrb.mxu0 %v623_v47  ;;  %393 = vmatpush.bf16.msrb.mxu1 %v687_v48  ;;  %v663_v16 = vor.u32 %v788_v13, %v660_v14  ;;  %v650_v19 = vld [vmem:[#allocation7 + $0x90] sm:$0xf]  ;;  %v587_v20 = vor.u32 %v771_v18, %v586_v17  ;;  %v787_v21 = vld [vmem:[#allocation7 + $0x94] sm:$0xf0]  ;;  %v770_v22 = vld [vmem:[#allocation7 + $0x14] sm:$0xf] }
  0x28   :  { %v588_v23 = vld [vmem:[#allocation7 + $0x18] sm:$0xf0]  ;;  %v651_v24 = vor.u32 %v787_v21, %v650_v19  ;;  %v786_v26 = vld [vmem:[#allocation7 + $0x94] sm:$0xf]  ;;  %v578_v29 = vld [vmem:[#allocation7] sm:$0xf] }
  0x29   :  { %356 = vmatpush.bf16.msra.mxu2 %v603_v0  ;;  %v591_v25 = vor.u32 %v770_v22, %v588_v23  ;;  %v652_v27 = vld [vmem:[#allocation7 + $0x98] sm:$0xf0]  ;;  %v769_v30 = vld [vmem:[#allocation7 + $0x4] sm:$0xf0]  ;;  %v642_v31 = vld [vmem:[#allocation7 + $0x80] sm:$0xf] }
  0x2a   :  { %369 = vmatpush.bf16.msra.mxu3 %v667_v1  ;;  %v655_v28 = vor.u32 %v786_v26, %v652_v27  ;;  %v579_v32 = vor.u32 %v769_v30, %v578_v29  ;;  %v785_v33 = vld [vmem:[#allocation7 + $0x84] sm:$0xf0]  ;;  %v768_v34 = vld [vmem:[#allocation7 + $0x4] sm:$0xf]  ;;  %v580_v35 = vld [vmem:[#allocation7 + $0x8] sm:$0xf0] }
  0x2b   :  { %381 = vmatpush.bf16.msrb.mxu0 %v615_v59  ;;  %394 = vmatpush.bf16.msrb.mxu1 %v679_v60  ;;  %v643_v36 = vor.u32 %v785_v33, %v642_v31  ;;  %v583_v37 = vor.u32 %v768_v34, %v580_v35  ;;  %v784_v38 = vld [vmem:[#allocation7 + $0x84] sm:$0xf]  ;;  %v644_v39 = vld [vmem:[#allocation7 + $0x88] sm:$0xf0]  ;;  %v815_v41 = vld [vmem:[#allocation9 + $0x78] sm:$0xff] }
  0x2c   :  { %v647_v40 = vor.u32 %v784_v38, %v644_v39  ;;  %v807_v42 = vld [vmem:[#allocation9 + $0x38] sm:$0xff]  ;;  %v814_v43 = vld [vmem:[#allocation9 + $0x70] sm:$0xff]  ;;  %v813_v45 = vld [vmem:[#allocation9 + $0x68] sm:$0xff] }
  0x2d   :  { %357 = vmatpush.bf16.msra.mxu2 %v595_v10  ;;  %v806_v44 = vld [vmem:[#allocation9 + $0x30] sm:$0xff]  ;;  %v805_v46 = vld [vmem:[#allocation9 + $0x28] sm:$0xff]  ;;  %v812_v47 = vld [vmem:[#allocation9 + $0x60] sm:$0xff] }
  0x2e   :  { %370 = vmatpush.bf16.msra.mxu3 %v659_v11  ;;  %v804_v48 = vld [vmem:[#allocation9 + $0x20] sm:$0xff]  ;;  %v811_v49 = vld [vmem:[#allocation9 + $0x58] sm:$0xff]  ;;  %v810_v51 = vld [vmem:[#allocation9 + $0x50] sm:$0xff] }
  0x2f   :  { %382 = vmatpush.bf16.msrb.mxu0 %v607_v7  ;;  %395 = vmatpush.bf16.msrb.mxu1 %v671_v8  ;;  %v102_v50 = vld [vmem:[#allocation6] sm:$0x3]  ;;  %v809_v1 = vld [vmem:[#allocation9 + $0x48] sm:$0xff]  ;;  %v802_v2 = vld [vmem:[#allocation9 + $0x10] sm:$0xff] }
  0x30   :  { %v104_v52 = vperm.slane %v102_v50, 0  ;;  %v105_v53 = vperm.slane %v102_v50, 1  ;;  %v803_v0 = vld [vmem:[#allocation9 + $0x18] sm:$0xff]  ;;  %v808_v3 = vld [vmem:[#allocation9 + $0x40] sm:$0xff]  ;;  %v801_v4 = vld [vmem:[#allocation9 + $0x8] sm:$0xff] }
  0x31   :  { %358 = vmatpush.bf16.msra.mxu2 %v587_v20  ;;  %v800_v5 = vld [vmem:[#allocation9] sm:$0xff]  ;;  %v186_v6 = vld [vmem:[%s1033_s4] sm:$0x3] }
  0x32   :  { %371 = vmatpush.bf16.msra.mxu3 %v651_v24  ;;  %v189_v7 = vperm.slane %v186_v6, 1  ;;  %v188_v11 = vperm.slane %v186_v6, 0  ;;  %v825_v26 = vld [vmem:[%s1035_s6] ss:$0 sm:$0xff] }
  0x33   :  { %383 = vmatpush.bf16.msrb.mxu0 %v599_v15  ;;  %396 = vmatpush.bf16.msrb.mxu1 %v663_v16 }
  0x35   :  { %359 = vmatpush.bf16.msra.mxu2 %v579_v32 }
  0x36   :  { %372 = vmatpush.bf16.msra.mxu3 %v643_v36 }
  0x37   :  { %384 = vmatpush.bf16.msrb.mxu0 %v591_v25  ;;  %397 = vmatpush.bf16.msrb.mxu1 %v655_v28 }
  0x39   :  { %540 = vmatpush.bf16.msrb.mxu2 %v807_v42 }
  0x3a   :  { %553 = vmatpush.bf16.msrb.mxu3 %v815_v41 }
  0x3b   :  { %385 = vmatpush.bf16.msrb.mxu0 %v583_v37  ;;  %398 = vmatpush.bf16.msrb.mxu1 %v647_v40 }
  0x3d   :  { %541 = vmatpush.bf16.msrb.mxu2 %v806_v44 }
  0x3e   :  { %554 = vmatpush.bf16.msrb.mxu3 %v814_v43 }
  0x41   :  { %542 = vmatpush.bf16.msrb.mxu2 %v805_v46 }
  0x42   :  { %555 = vmatpush.bf16.msrb.mxu3 %v813_v45 }
  0x45   :  { %543 = vmatpush.bf16.msrb.mxu2 %v804_v48 }
  0x46   :  { %556 = vmatpush.bf16.msrb.mxu3 %v812_v47 }
  0x49   :  { %544 = vmatpush.bf16.msrb.mxu2 %v803_v0 }
  0x4a   :  { %557 = vmatpush.bf16.msrb.mxu3 %v811_v49 }
  0x4d   :  { %545 = vmatpush.bf16.msrb.mxu2 %v802_v2 }
  0x4e   :  { %558 = vmatpush.bf16.msrb.mxu3 %v810_v51 }
  0x51   :  { %546 = vmatpush.bf16.msrb.mxu2 %v801_v4 }
  0x52   :  { %559 = vmatpush.bf16.msrb.mxu3 %v809_v1 }
  0x55   :  { %547 = vmatpush.bf16.msrb.mxu2 %v800_v5 }
  0x56   :  { %560 = vmatpush.bf16.msrb.mxu3 %v808_v3 }
  0x9b   :  { %v133_v54 = vpop.f32.mrf.mxu0 }
  0x9c   :  { %v134_v56 = vadd.f32 %v133_v54, %v104_v52 }
  0x9d   :  { %v146_v55 = vpop.f32.mrf.mxu1 }
  0x9e   :  { %v147_v57 = vadd.f32 %v146_v55, %v105_v53  ;;  %v150_v58 = vmax.f32 %v134_v56, 0.0 }
  0xa0   :  { %v151_v59 = vmax.f32 %v147_v57, 0.0  ;;  %v152_v60 = vpack.c.bf16 %v150_v58, %v150_v58 }
  0xa2   :  { %v153_v61 = vpack.c.bf16 %v151_v59, %v151_v59  ;;  %360 = vmatmul.bf16.vlgmr.msra.gmra.mxu2 %v152_v60  ;;  %386 = vmatmul.bf16.vlgmr.msrb.gmra.mxu0 %v152_v60 }
  0xa3   :  { %v135_v62 = vpop.f32.mrf.mxu0 }
  0xa4   :  { %373 = vmatmul.bf16.vlgmr.msra.gmra.mxu3 %v153_v61  ;;  %399 = vmatmul.bf16.vlgmr.msrb.gmra.mxu1 %v153_v61 }
  0xa5   :  { %v148_v63 = vpop.f32.mrf.mxu1 }
 0x11f   :  { %v387_v8 = vpop.f32.mrf.mxu0 }
 0x120   :  { %v388_v10 = vadd.f32 %v387_v8, %v189_v7 }
 0x121   :  { %v400_v9 = vpop.f32.mrf.mxu1 }
 0x122   :  { %v401_v12 = vadd.f32 %v400_v9, %v388_v10 }
 0x124   :  { %v405_v13 = vmax.f32 %v401_v12, 0.0 }
 0x125   :  { %v361_v14 = vpop.f32.mrf.mxu2 }
 0x126   :  { %v362_v16 = vadd.f32 %v361_v14, %v188_v11  ;;  %v407_v17 = vpack.c.bf16 %v405_v13, %v405_v13 }
 0x127   :  { %v374_v15 = vpop.f32.mrf.mxu3  ;;  %v389_v19 = vpop.f32.mrf.mxu0 }
 0x128   :  { %v375_v18 = vadd.f32 %v374_v15, %v362_v16  ;;  %561 = vmatmul.bf16.vlgmr.msrb.gmra.mxu3 %v407_v17 }
 0x129   :  { %v402_v20 = vpop.f32.mrf.mxu1 }
 0x12a   :  { %v404_v21 = vmax.f32 %v375_v18, 0.0 }
 0x12c   :  { %v406_v22 = vpack.c.bf16 %v404_v21, %v404_v21 }
 0x12d   :  { %v363_v23 = vpop.f32.mrf.mxu2 }
 0x12e   :  { %548 = vmatmul.bf16.vlgmr.msrb.gmra.mxu2 %v406_v22 }
 0x12f   :  { %v376_v24 = vpop.f32.mrf.mxu3 }
 0x1ab   :  { %v562_v25 = vpop.f32.mrf.mxu3 }
 0x1b1   :  { %v549_v27 = vpop.f32.mrf.mxu2 }
 0x1b2   :  { %v550_v28 = vadd.f32 %v825_v26, %v549_v27 }
 0x1b3   :  { %v564_v30 = vpop.f32.mrf.mxu3 }
 0x1b4   :  { %v563_v29 = vadd.f32 %v562_v25, %v550_v28 }
 0x1b6   :  { %566 = vst [vmem:[%s1036_s7] sm:$0xff] %v563_v29 }
 0x1b9   :  { %v551_v31 = vpop.f32.mrf.mxu2 }
 0x1ba   :  { %571 = vsyncpa [#allocation3], 1 }
 0x1bb   :  { %572 = vsyncpa [#allocation5], 1 }
 0x1bc   :  { %573 = vsyncpa [#allocation8], 1 }

</bundles_post_ra>
